<compile_context>
chip_gen: v5e
topology: v5e:2x2
jax: 0.10.0
libtpu: 0.0.40
codegen_flags: <defaults>
</compile_context>

<pallas_src>
import functools

import jax
import jax.numpy as jnp
from jax.experimental import pallas as pl
from jax.experimental.pallas import tpu as pltpu

# FocalLoss.__init__ defaults
ALPHA = 1.0
GAMMA = 2.0  # integer exponent -> implemented as a square inside the kernel

LANE = 128            # last dim maps to the 128-wide lane axis
MAX_ROW_BLOCK = 2048  # 2048*128*4 B = 1 MiB f32 per input block (x2 inputs, double-buffered)


def _focal_loss_kernel(flag_ref, pred_ref, tgt_ref, out_ref, acc_ref, *,
                       n_valid, row_block):
    i = pl.program_id(0)

    @pl.when(i == 0)
    def _init():
        acc_ref[...] = jnp.zeros_like(acc_ref)

    preds = pred_ref[...].astype(jnp.float32)   # (row_block, LANE)
    tgts = tgt_ref[...].astype(jnp.float32)     # (row_block, LANE)

    # Mask off padded elements (global flattened index >= n_valid).
    rows = jax.lax.broadcasted_iota(jnp.int32, (row_block, LANE), 0)
    cols = jax.lax.broadcasted_iota(jnp.int32, (row_block, LANE), 1)
    gidx = (i * row_block + rows) * LANE + cols
    mask = gidx < n_valid

    def accumulate(probs, log_p, log_1mp):
        # ce = binary_cross_entropy(probs, targets, reduction='none')
        ce = -(tgts * log_p + (1.0 - tgts) * log_1mp)
        # 1 - p_t = 1 - (probs*t + (1-probs)*(1-t)) = probs + t - 2*probs*t
        one_minus_pt = probs + tgts - 2.0 * probs * tgts
        focal = ALPHA * (one_minus_pt * one_minus_pt) * ce   # gamma == 2 -> square
        focal = jnp.where(mask, focal, 0.0)
        # Fold the (row_block, 128) tile down to one vreg-shaped (8, 128) partial sum:
        # summing over the leading (sublane-split) axis is elementwise vreg adds (VPU).
        partial = jnp.sum(focal.reshape(row_block // 8, 8, LANE), axis=0)
        acc_ref[...] += partial

    use_sigmoid = flag_ref[0] != 0

    @pl.when(use_sigmoid)
    def _sigmoid_path():
        # Numerically stable softplus form:
        #   log(sigmoid(x))     = min(x, 0) - log(1 + exp(-|x|))
        #   log(1 - sigmoid(x)) = -max(x, 0) - log(1 + exp(-|x|))
        x = preds
        a = jnp.exp(-jnp.abs(x))                 # EUP
        log1pa = jnp.log(1.0 + a)                # EUP
        log_p = jnp.maximum(jnp.minimum(x, 0.0) - log1pa, -100.0)
        log_1mp = jnp.maximum(-jnp.maximum(x, 0.0) - log1pa, -100.0)
        probs = jnp.where(x >= 0.0, 1.0, a) / (1.0 + a)   # sigmoid(x), reusing a
        accumulate(probs, log_p, log_1mp)

    @pl.when(jnp.logical_not(use_sigmoid))
    def _prob_path():
        probs = preds
        log_p = jnp.maximum(jnp.log(probs), -100.0)
        log_1mp = jnp.maximum(jnp.log(1.0 - probs), -100.0)
        accumulate(probs, log_p, log_1mp)

    @pl.when(i == pl.num_programs(0) - 1)
    def _finalize():
        # Single cross-lane/sublane reduce + mean scale, done exactly once.
        out_ref[...] = (jnp.sum(acc_ref[...]) * (1.0 / n_valid)).reshape(1, 1)


def focal_loss(predictions: jnp.ndarray, targets: jnp.ndarray) -> jnp.ndarray:
    """predictions, targets: shape (B,). Returns scalar focal loss (f32)."""
    B = predictions.shape[0]

    # Lane/sublane-dense layout: pad to (n_rows, 128) with n_rows a multiple of the
    # row block (which is itself a multiple of 8).
    rows_needed = pl.cdiv(B, LANE)
    row_block = min(MAX_ROW_BLOCK, ((rows_needed + 7) // 8) * 8)
    n_rows = pl.cdiv(rows_needed, row_block) * row_block
    padded_B = n_rows * LANE
    grid = n_rows // row_block

    pad = padded_B - B
    p2 = jnp.pad(predictions, (0, pad)).reshape(n_rows, LANE)
    t2 = jnp.pad(targets, (0, pad)).reshape(n_rows, LANE)

    # Global sigmoid decision (PyTorch checks min/max of the WHOLE tensor) computed once
    # here, passed to the kernel as a prefetched SMEM scalar so every tile agrees.
    needs_sigmoid = jnp.logical_or(jnp.max(predictions) > 1.0,
                                   jnp.min(predictions) < 0.0)
    flag = needs_sigmoid.astype(jnp.int32).reshape(1)

    kernel = functools.partial(_focal_loss_kernel, n_valid=B, row_block=row_block)

    out = pl.pallas_call(
        kernel,
        out_shape=jax.ShapeDtypeStruct((1, 1), jnp.float32),
        grid_spec=pltpu.PrefetchScalarGridSpec(
            num_scalar_prefetch=1,
            grid=(grid,),
            in_specs=[
                pl.BlockSpec((row_block, LANE), lambda i, flag_ref: (i, 0)),
                pl.BlockSpec((row_block, LANE), lambda i, flag_ref: (i, 0)),
            ],
            out_specs=pl.BlockSpec((1, 1), lambda i, flag_ref: (0, 0)),
            scratch_shapes=[pltpu.VMEM((8, LANE), jnp.float32)],
        ),
        compiler_params=pltpu.CompilerParams(
            dimension_semantics=("arbitrary",)),  # row axis is the reduction axis
    )(flag, p2, t2)
    return out[0, 0]


if __name__ == "__main__":
    key = jax.random.PRNGKey(0)
    k_pred, k_tgt = jax.random.split(key)

    B = 8  # small batch, consistent with (B,) predictions / targets
    # Logits (outside [0,1]) -> exercises the sigmoid path.
    predictions = jax.random.normal(k_pred, (B,), dtype=jnp.float32) * 2.0
    targets = jax.random.bernoulli(k_tgt, 0.5, (B,)).astype(jnp.float32)

    loss = focal_loss(predictions, targets)
    jax.block_until_ready(loss)

    # Pure-JAX reference (same math as the PyTorch module), sigmoid path.
    probs = jax.nn.sigmoid(predictions)
    ce = -(targets * jnp.maximum(jnp.log(probs), -100.0)
           + (1.0 - targets) * jnp.maximum(jnp.log(1.0 - probs), -100.0))
    p_t = probs * targets + (1.0 - probs) * (1.0 - targets)
    ref = jnp.mean(ALPHA * (1.0 - p_t) ** GAMMA * ce)
    assert jnp.allclose(loss, ref, rtol=1e-5, atol=1e-6), (loss, ref)

    # Second check: inputs already in [0, 1] -> no-sigmoid path.
    probs_in = jax.random.uniform(k_pred, (B,), dtype=jnp.float32,
                                  minval=0.01, maxval=0.99)
    loss2 = focal_loss(probs_in, targets)
    jax.block_until_ready(loss2)
    ce2 = -(targets * jnp.maximum(jnp.log(probs_in), -100.0)
            + (1.0 - targets) * jnp.maximum(jnp.log(1.0 - probs_in), -100.0))
    p_t2 = probs_in * targets + (1.0 - probs_in) * (1.0 - targets)
    ref2 = jnp.mean(ALPHA * (1.0 - p_t2) ** GAMMA * ce2)
    assert jnp.allclose(loss2, ref2, rtol=1e-5, atol=1e-6), (loss2, ref2)

    print("KERNEL_OK")
</pallas_src>

<mosaic_0001>
module attributes {stable_mosaic.version = 11 : i64} {
  func.func @_focal_loss_kernel(%arg0: i32, %arg1: memref<1xi32, #tpu.memory_space<smem>>, %arg2: memref<8x128xf32, #tpu.memory_space<vmem>>, %arg3: memref<8x128xf32, #tpu.memory_space<vmem>>, %arg4: memref<1x1xf32, #tpu.memory_space<vmem>>, %arg5: memref<8x128xf32, #tpu.memory_space<vmem>>) attributes {dimension_semantics = [#tpu.dimension_semantics<arbitrary>], iteration_bounds = array<i64: 1>, scalar_prefetch = 1 : i64, scratch_operands = 1 : i64, tpu.core_type = #tpu.core_type<tc>, window_params = [{transform_indices = @transform_0, window_bounds = array<i64: 8, 128>}, {transform_indices = @transform_1, window_bounds = array<i64: 8, 128>}, {pipeline_mode = #tpu.pipeline_mode<synchronous>, transform_indices = @transform_2, window_bounds = array<i64: 1, 1>}]} {
    %c0_i32 = arith.constant 0 : i32
    %0 = arith.cmpi eq, %arg0, %c0_i32 : i32
    %1 = arith.extui %0 : i1 to i32
    %c0_i32_0 = arith.constant 0 : i32
    %2 = arith.cmpi ne, %1, %c0_i32_0 : i32
    scf.if %2 {
      %cst = arith.constant 0.000000e+00 : f32
      %25 = vector.broadcast %cst : f32 to vector<8x128xf32>
      %c0_11 = arith.constant 0 : index
      %c0_12 = arith.constant 0 : index
      %26 = vector.load %arg5[%c0_11, %c0_12] : memref<8x128xf32, #tpu.memory_space<vmem>>, vector<8x128xf32>
      tpu.vector_store %arg5[%c0_11, %c0_12], %25 {strides = array<i32>} : memref<8x128xf32, #tpu.memory_space<vmem>>, vector<8x128xf32>,
    } else {
    }
    %c0 = arith.constant 0 : index
    %c0_1 = arith.constant 0 : index
    %3 = vector.load %arg2[%c0, %c0_1] : memref<8x128xf32, #tpu.memory_space<vmem>>, vector<8x128xf32>
    %c0_2 = arith.constant 0 : index
    %c0_3 = arith.constant 0 : index
    %4 = vector.load %arg3[%c0_2, %c0_3] : memref<8x128xf32, #tpu.memory_space<vmem>>, vector<8x128xf32>
    %5 = tpu.iota {dimensions = array<i32: 0>} : vector<8x128xi32>
    %6 = tpu.iota {dimensions = array<i32: 1>} : vector<8x128xi32>
    %c8_i32 = arith.constant 8 : i32
    %7 = arith.muli %arg0, %c8_i32 : i32
    %8 = vector.broadcast %7 : i32 to vector<8x128xi32>
    %9 = arith.addi %8, %5 : vector<8x128xi32>
    %c128_i32 = arith.constant 128 : i32
    %10 = vector.broadcast %c128_i32 : i32 to vector<8x128xi32>
    %11 = arith.muli %9, %10 : vector<8x128xi32>
    %12 = arith.addi %11, %6 : vector<8x128xi32>
    %c8_i32_4 = arith.constant 8 : i32
    %13 = vector.broadcast %c8_i32_4 : i32 to vector<8x128xi32>
    %14 = arith.cmpi slt, %12, %13 : vector<8x128xi32>
    %c0_5 = arith.constant 0 : index
    %15 = memref.load %arg1[%c0_5] : memref<1xi32, #tpu.memory_space<smem>>
    %c0_i32_6 = arith.constant 0 : i32
    %16 = arith.cmpi ne, %15, %c0_i32_6 : i32
    %17 = arith.extui %16 : i1 to i32
    %c0_i32_7 = arith.constant 0 : i32
    %18 = arith.cmpi ne, %17, %c0_i32_7 : i32
    scf.if %18 {
      %25 = math.absf %3 : vector<8x128xf32>
      %cst = arith.constant 0.000000e+00 : f32
      %26 = vector.broadcast %cst : f32 to vector<8x128xf32>
      %27 = arith.subf %26, %25 : vector<8x128xf32>
      %28 = math.exp %27 : vector<8x128xf32>
      %cst_11 = arith.constant 1.000000e+00 : f32
      %29 = vector.broadcast %cst_11 : f32 to vector<8x128xf32>
      %30 = arith.addf %29, %28 : vector<8x128xf32>
      %31 = math.log %30 : vector<8x128xf32>
      %cst_12 = arith.constant 0.000000e+00 : f32
      %32 = vector.broadcast %cst_12 : f32 to vector<8x128xf32>
      %33 = arith.minimumf %3, %32 : vector<8x128xf32>
      %34 = arith.subf %33, %31 : vector<8x128xf32>
      %cst_13 = arith.constant -1.000000e+02 : f32
      %35 = vector.broadcast %cst_13 : f32 to vector<8x128xf32>
      %36 = arith.maximumf %34, %35 : vector<8x128xf32>
      %cst_14 = arith.constant 0.000000e+00 : f32
      %37 = vector.broadcast %cst_14 : f32 to vector<8x128xf32>
      %38 = arith.maximumf %3, %37 : vector<8x128xf32>
      %cst_15 = arith.constant 0.000000e+00 : f32
      %39 = vector.broadcast %cst_15 : f32 to vector<8x128xf32>
      %40 = arith.subf %39, %38 : vector<8x128xf32>
      %41 = arith.subf %40, %31 : vector<8x128xf32>
      %cst_16 = arith.constant -1.000000e+02 : f32
      %42 = vector.broadcast %cst_16 : f32 to vector<8x128xf32>
      %43 = arith.maximumf %41, %42 : vector<8x128xf32>
      %cst_17 = arith.constant 0.000000e+00 : f32
      %44 = vector.broadcast %cst_17 : f32 to vector<8x128xf32>
      %45 = arith.cmpf oge, %3, %44 : vector<8x128xf32>
      %cst_18 = arith.constant 1.000000e+00 : f32
      %46 = vector.broadcast %cst_18 : f32 to vector<8x128xf32>
      %47 = arith.select %45, %46, %28 : vector<8x128xi1>, vector<8x128xf32>
      %cst_19 = arith.constant 1.000000e+00 : f32
      %48 = vector.broadcast %cst_19 : f32 to vector<8x128xf32>
      %49 = arith.addf %48, %28 : vector<8x128xf32>
      %50 = arith.divf %47, %49 : vector<8x128xf32>
      %51 = arith.mulf %4, %36 : vector<8x128xf32>
      %cst_20 = arith.constant 1.000000e+00 : f32
      %52 = vector.broadcast %cst_20 : f32 to vector<8x128xf32>
      %53 = arith.subf %52, %4 : vector<8x128xf32>
      %54 = arith.mulf %53, %43 : vector<8x128xf32>
      %55 = arith.addf %51, %54 : vector<8x128xf32>
      %cst_21 = arith.constant 0.000000e+00 : f32
      %56 = vector.broadcast %cst_21 : f32 to vector<8x128xf32>
      %57 = arith.subf %56, %55 : vector<8x128xf32>
      %58 = arith.addf %50, %4 : vector<8x128xf32>
      %cst_22 = arith.constant 2.000000e+00 : f32
      %59 = vector.broadcast %cst_22 : f32 to vector<8x128xf32>
      %60 = arith.mulf %59, %50 : vector<8x128xf32>
      %61 = arith.mulf %60, %4 : vector<8x128xf32>
      %62 = arith.subf %58, %61 : vector<8x128xf32>
      %63 = arith.mulf %62, %62 : vector<8x128xf32>
      %cst_23 = arith.constant 1.000000e+00 : f32
      %64 = vector.broadcast %cst_23 : f32 to vector<8x128xf32>
      %65 = arith.mulf %64, %63 : vector<8x128xf32>
      %66 = arith.mulf %65, %57 : vector<8x128xf32>
      %cst_24 = arith.constant 0.000000e+00 : f32
      %67 = vector.broadcast %cst_24 : f32 to vector<8x128xf32>
      %68 = arith.select %14, %66, %67 : vector<8x128xi1>, vector<8x128xf32>
      %69 = vector.shape_cast %68 : vector<8x128xf32> to vector<1x8x128xf32>
      %cst_25 = arith.constant dense<0.000000e+00> : vector<8x128xf32>
      %70 = vector.multi_reduction <add>, %69, %cst_25 [0] : vector<1x8x128xf32> to vector<8x128xf32>
      %c0_26 = arith.constant 0 : index
      %c0_27 = arith.constant 0 : index
      %71 = vector.load %arg5[%c0_26, %c0_27] : memref<8x128xf32, #tpu.memory_space<vmem>>, vector<8x128xf32>
      %72 = arith.addf %71, %70 : vector<8x128xf32>
      %c0_28 = arith.constant 0 : index
      %c0_29 = arith.constant 0 : index
      %73 = vector.load %arg5[%c0_28, %c0_29] : memref<8x128xf32, #tpu.memory_space<vmem>>, vector<8x128xf32>
      tpu.vector_store %arg5[%c0_28, %c0_29], %72 {strides = array<i32>} : memref<8x128xf32, #tpu.memory_space<vmem>>, vector<8x128xf32>,
    } else {
    }
    %true = arith.constant true
    %19 = arith.xori %16, %true : i1
    %20 = arith.extui %19 : i1 to i32
    %c0_i32_8 = arith.constant 0 : i32
    %21 = arith.cmpi ne, %20, %c0_i32_8 : i32
    scf.if %21 {
      %25 = math.log %3 : vector<8x128xf32>
      %cst = arith.constant -1.000000e+02 : f32
      %26 = vector.broadcast %cst : f32 to vector<8x128xf32>
      %27 = arith.maximumf %25, %26 : vector<8x128xf32>
      %cst_11 = arith.constant 1.000000e+00 : f32
      %28 = vector.broadcast %cst_11 : f32 to vector<8x128xf32>
      %29 = arith.subf %28, %3 : vector<8x128xf32>
      %30 = math.log %29 : vector<8x128xf32>
      %cst_12 = arith.constant -1.000000e+02 : f32
      %31 = vector.broadcast %cst_12 : f32 to vector<8x128xf32>
      %32 = arith.maximumf %30, %31 : vector<8x128xf32>
      %33 = arith.mulf %4, %27 : vector<8x128xf32>
      %cst_13 = arith.constant 1.000000e+00 : f32
      %34 = vector.broadcast %cst_13 : f32 to vector<8x128xf32>
      %35 = arith.subf %34, %4 : vector<8x128xf32>
      %36 = arith.mulf %35, %32 : vector<8x128xf32>
      %37 = arith.addf %33, %36 : vector<8x128xf32>
      %cst_14 = arith.constant 0.000000e+00 : f32
      %38 = vector.broadcast %cst_14 : f32 to vector<8x128xf32>
      %39 = arith.subf %38, %37 : vector<8x128xf32>
      %40 = arith.addf %3, %4 : vector<8x128xf32>
      %cst_15 = arith.constant 2.000000e+00 : f32
      %41 = vector.broadcast %cst_15 : f32 to vector<8x128xf32>
      %42 = arith.mulf %41, %3 : vector<8x128xf32>
      %43 = arith.mulf %42, %4 : vector<8x128xf32>
      %44 = arith.subf %40, %43 : vector<8x128xf32>
      %45 = arith.mulf %44, %44 : vector<8x128xf32>
      %cst_16 = arith.constant 1.000000e+00 : f32
      %46 = vector.broadcast %cst_16 : f32 to vector<8x128xf32>
      %47 = arith.mulf %46, %45 : vector<8x128xf32>
      %48 = arith.mulf %47, %39 : vector<8x128xf32>
      %cst_17 = arith.constant 0.000000e+00 : f32
      %49 = vector.broadcast %cst_17 : f32 to vector<8x128xf32>
      %50 = arith.select %14, %48, %49 : vector<8x128xi1>, vector<8x128xf32>
      %51 = vector.shape_cast %50 : vector<8x128xf32> to vector<1x8x128xf32>
      %cst_18 = arith.constant dense<0.000000e+00> : vector<8x128xf32>
      %52 = vector.multi_reduction <add>, %51, %cst_18 [0] : vector<1x8x128xf32> to vector<8x128xf32>
      %c0_19 = arith.constant 0 : index
      %c0_20 = arith.constant 0 : index
      %53 = vector.load %arg5[%c0_19, %c0_20] : memref<8x128xf32, #tpu.memory_space<vmem>>, vector<8x128xf32>
      %54 = arith.addf %53, %52 : vector<8x128xf32>
      %c0_21 = arith.constant 0 : index
      %c0_22 = arith.constant 0 : index
      %55 = vector.load %arg5[%c0_21, %c0_22] : memref<8x128xf32, #tpu.memory_space<vmem>>, vector<8x128xf32>
      tpu.vector_store %arg5[%c0_21, %c0_22], %54 {strides = array<i32>} : memref<8x128xf32, #tpu.memory_space<vmem>>, vector<8x128xf32>,
    } else {
    }
    %c0_i32_9 = arith.constant 0 : i32
    %22 = arith.cmpi eq, %arg0, %c0_i32_9 : i32
    %23 = arith.extui %22 : i1 to i32
    %c0_i32_10 = arith.constant 0 : i32
    %24 = arith.cmpi ne, %23, %c0_i32_10 : i32
    scf.if %24 {
      %c0_11 = arith.constant 0 : index
      %c0_12 = arith.constant 0 : index
      %25 = vector.load %arg5[%c0_11, %c0_12] : memref<8x128xf32, #tpu.memory_space<vmem>>, vector<8x128xf32>
      %26 = vector.shape_cast %25 : vector<8x128xf32> to vector<1x8x128xf32>
      %cst = arith.constant dense<0.000000e+00> : vector<1xf32>
      %27 = vector.multi_reduction <add>, %26, %cst [1, 2] : vector<1x8x128xf32> to vector<1xf32>
      %28 = vector.shape_cast %27 : vector<1xf32> to vector<1x1x1xf32>
      %29 = vector.extract %28[0, 0, 0] : f32 from vector<1x1x1xf32>
      %cst_13 = arith.constant 1.250000e-01 : f32
      %30 = arith.mulf %29, %cst_13 : f32
      %31 = vector.broadcast %30 : f32 to vector<1x1xf32>
      %c0_14 = arith.constant 0 : index
      %c0_15 = arith.constant 0 : index
      %32 = vector.load %arg4[%c0_14, %c0_15] : memref<1x1xf32, #tpu.memory_space<vmem>>, vector<1x1xf32>
      tpu.vector_store %arg4[%c0_14, %c0_15], %31 {strides = array<i32>} : memref<1x1xf32, #tpu.memory_space<vmem>>, vector<1x1xf32>,
    } else {
    }
    return
  }
  func.func @transform_0(%arg0: i32, %arg1: memref<1xi32, #tpu.memory_space<smem>>) -> (i32, i32) {
    %c0_i32 = arith.constant 0 : i32
    %c0_i32_0 = arith.constant 0 : i32
    return %arg0, %c0_i32 : i32, i32
  }
  func.func @transform_1(%arg0: i32, %arg1: memref<1xi32, #tpu.memory_space<smem>>) -> (i32, i32) {
    %c0_i32 = arith.constant 0 : i32
    %c0_i32_0 = arith.constant 0 : i32
    return %arg0, %c0_i32 : i32, i32
  }
  func.func @transform_2(%arg0: i32, %arg1: memref<1xi32, #tpu.memory_space<smem>>) -> (i32, i32) {
    %c0_i32 = arith.constant 0 : i32
    %c0_i32_0 = arith.constant 0 : i32
    %c0_i32_1 = arith.constant 0 : i32
    return %c0_i32, %c0_i32_0 : i32, i32
  }
}

</mosaic_0001>

<bundles_post_ra>
// kernel: tpu_custom_call.1
= control target key start
LH: loop header
LB: loop body
LE: loop exit
PB: predicated region body
PF: predicated region fallthrough
CT: control target
= control target key end

     0   :  { %9 = vsyncpa [#allocation6], 0  ;;  %s335_s0 = inlined_call_operand.<no memory space> [shape: s32[1], index: 0, kind: input, shape index: {}]   ;;  %s336_s1 = inlined_call_operand.hbm [shape: f32[8,128], index: 1, kind: input, shape index: {}]   ;;  %s337_s2 = inlined_call_operand.hbm [shape: f32[8,128], index: 2, kind: input, shape index: {}]   ;;  %s338_s3 = inlined_call_operand.hbm [shape: f32[1,1], index: 3, kind: output, shape index: {}]  }
   0x1   :  { %10 = vsyncpa [#allocation9], 0 }
   0x2   :  { %11 = vsyncpa [#allocation7], 0  ;;  %s17_s14 = sshll.u32 %s336_s1, 4  ;;  %s269_s15 = smov [#allocation5]   ;;  %s18_s14 = int_to_ptr.hbm [resolvable:$true] %s17_s14 }
   0x3   :  { %s19_s16 = sshll.u32 %s269_s15, 4  ;;  %s28_s19 = sshll.u32 %s337_s2, 4  ;;  %s20_s16 = int_to_ptr.vmem [resolvable:$true] %s19_s16  ;;  %s29_s19 = int_to_ptr.hbm [resolvable:$true] %s28_s19 }
   0x4   :  { %22 = dma.hbm_to_vmem [thread:$0]  %s18_s14, 128, %s20_s16, [#allocation6]  }
   0x5   :  { %s270_s20 = smov [#allocation8]  }
   0x6   :  { %s30_s21 = sshll.u32 %s270_s20, 4  ;;  %s31_s21 = int_to_ptr.vmem [resolvable:$true] %s30_s21 }
   0x7   :  { %33 = dma.hbm_to_vmem [thread:$0]  %s29_s19, 128, %s31_s21, [#allocation9]  }
   0x8   :  { %263 = dma.done.wait [#allocation6], 128  }
   0x9   :  { %264 = vsyncadd [#allocation6], 4294967168 }
   0xa   :  { %265 = dma.done.wait [#allocation9], 128  }
   0xb   :  { %266 = vsyncadd [#allocation9], 4294967168  ;;  %v49_v0 = vlaneseq  ;;  %v271_v1 = vmov 0.0   ;;  %v301_v6 = vld [vmem:[#allocation5] sm:$0xff]  ;;  %v303_v7 = vld [vmem:[#allocation8] sm:$0xff]  ;;  %p173_p0 = scmp.eq.s32.totalorder %s335_s0, 0 }
   0xc   :  { %46 = vst [vmem:[#allocation2] sm:$0xff] %v271_v1 }
   0xd   :  { %v50_v2 = vshrl.u32 %v49_v0, 7  ;;  %v52_v3 = vand.u32 127, %v49_v0 }
   0xf   :  { %v56_v4 = vmul.u32 128, %v50_v2  ;;  %63 = sbr.rel (%p173_p0) target bundleno = 69 (0x45), region = 25 }
  0x11   :  { %v299_v5 = vadd.s32 %v56_v4, %v52_v3 }
  0x13   :  { %vm58_vm0 = vcmp.lt.s32.totalorder %v299_v5, 8 }
  0x14   :  { %v64_v8 = vand.u32 2147483647, %v301_v6  ;;  %v74_v13 = vmax.f32 %v301_v6, 0.0  ;;  %v71_v14 = vmin.f32 %v301_v6, 0.0  ;;  %vm78_vm3 = vcmp.ge.f32.partialorder %v301_v6, 0.0  ;;  %v108_v45 = vld [vmem:[#allocation2] sm:$0xff] }
  0x15   :  { %v96_v28 = vsub.f32 1.0, %v303_v7 }
  0x16   :  { %v65_v9 = vsub.f32 0.0, %v64_v8  ;;  %v75_v15 = vsub.f32 0.0, %v74_v13 }
  0x18   :  { %v66_v10 = vmul.f32 1.442695, %v65_v9 }
  0x1a   :  { %181 = vpow2.f32 %v66_v10 }
  0x20   :  { %v182_v11 = vpop.eup %181 }
  0x21   :  { %v68_v12 = vadd.f32 1.0, %v182_v11  ;;  %v79_v31 = vsel %vm78_vm3, 1.0, %v182_v11 }
  0x23   :  { %183 = vlog2.f32 %v68_v12  ;;  %v91_v22 = vand.u32 2147483648, %v68_v12  ;;  %vm85_vm1 = vweird.f32 %v68_v12  ;;  %v89_v24 = vand.u32 2147483647, %v68_v12 }
  0x24   :  { %185 = vrcp.f32 %v68_v12 }
  0x25   :  { %v92_v29 = vor.u32 1.1754944e-38, %v91_v22  ;;  %vm90_vm5 = vcmp.eq.f32.partialorder %v89_v24, 8.507059e+37 }
  0x29   :  { %v184_v16 = vpop.eup %183 }
  0x2a   :  { %v186_v17 = vpop.eup %185  ;;  %v70_v18 = vmul.f32 0.6931472, %v184_v16 }
  0x2b   :  { %v81_v19 = vmul.f32 %v186_v17, %v68_v12  ;;  %vm86_vm2 = vweird.f32 %v186_v17 }
  0x2c   :  { %v72_v20 = vsub.f32 %v71_v14, %v70_v18  ;;  %v76_v21 = vsub.f32 %v75_v15, %v70_v18  ;;  %vm87_vm4 = vmor %vm85_vm1, %vm86_vm2 }
  0x2d   :  { %v82_v23 = vsub.f32 1.0, %v81_v19 }
  0x2e   :  { %v73_v25 = vmax.f32 %v72_v20, -100.0  ;;  %v77_v26 = vmax.f32 %v76_v21, -100.0 }
  0x2f   :  { %v83_v27 = vmul.f32 %v186_v17, %v82_v23 }
  0x30   :  { %v95_v33 = vmul.f32 %v73_v25, %v303_v7  ;;  %v97_v34 = vmul.f32 %v96_v28, %v77_v26 }
  0x31   :  { %v84_v30 = vadd.f32 %v186_v17, %v83_v27 }
  0x32   :  { %v98_v37 = vadd.f32 %v97_v34, %v95_v33 }
  0x33   :  { %v88_v32 = vsel %vm87_vm4, %v186_v17, %v84_v30 }
  0x34   :  { %v93_v35 = vsel %vm90_vm5, %v92_v29, %v88_v32  ;;  %v99_v41 = vsub.f32 0.0, %v98_v37 }
  0x35   :  { %v94_v36 = vmul.f32 %v93_v35, %v79_v31 }
  0x37   :  { %v100_v38 = vadd.f32 %v94_v36, %v303_v7  ;;  %v101_v39 = vmul.f32 2.0, %v94_v36 }
  0x39   :  { %v102_v40 = vmul.f32 %v101_v39, %v303_v7 }
  0x3b   :  { %v103_v42 = vsub.f32 %v100_v38, %v102_v40 }
  0x3d   :  { %v104_v43 = vmul.f32 %v103_v42, %v103_v42 }
  0x3f   :  { %v105_v44 = vmul.f32 %v104_v43, %v99_v41 }
  0x41   :  { %v106_v46 = vsel %vm58_vm0, %v105_v44, 0.0 }
  0x42   :  { %v109_v47 = vadd.f32 %v108_v45, %v106_v46 }
  0x44   :  { %110 = vst [vmem:[#allocation2] sm:$0xff] %v109_v47 }
  0x45 PF:  { %p174_p1 = scmp.ne.s32.totalorder %s335_s0, 0 }
  0x47   :  { %114 = sbr.rel (%p174_p1) target bundleno = 101 (0x65), region = 29 }
  0x4c   :  { %187 = vlog2.f32 %v301_v6  ;;  %v118_v48 = vsub.f32 1.0, %v301_v6  ;;  %v128_v49 = vmul.f32 2.0, %v301_v6  ;;  %v127_v52 = vadd.f32 %v303_v7, %v301_v6  ;;  %v135_v2 = vld [vmem:[#allocation2] sm:$0xff] }
  0x4d   :  { %v123_v57 = vsub.f32 1.0, %v303_v7 }
  0x4e   :  { %189 = vlog2.f32 %v118_v48  ;;  %v129_v53 = vmul.f32 %v128_v49, %v303_v7 }
  0x50   :  { %v130_v60 = vsub.f32 %v127_v52, %v129_v53 }
  0x52   :  { %v188_v50 = vpop.eup %187  ;;  %v131_v63 = vmul.f32 %v130_v60, %v130_v60 }
  0x53   :  { %v116_v51 = vmul.f32 0.6931472, %v188_v50 }
  0x54   :  { %v190_v54 = vpop.eup %189 }
  0x55   :  { %v117_v55 = vmax.f32 %v116_v51, -100.0  ;;  %v120_v56 = vmul.f32 0.6931472, %v190_v54 }
  0x57   :  { %v121_v58 = vmax.f32 %v120_v56, -100.0  ;;  %v122_v59 = vmul.f32 %v117_v55, %v303_v7 }
  0x59   :  { %v124_v61 = vmul.f32 %v123_v57, %v121_v58 }
  0x5b   :  { %v125_v62 = vadd.f32 %v124_v61, %v122_v59 }
  0x5d   :  { %v126_v0 = vsub.f32 0.0, %v125_v62 }
  0x5f   :  { %v132_v1 = vmul.f32 %v131_v63, %v126_v0 }
  0x61   :  { %v133_v3 = vsel %vm58_vm0, %v132_v1, 0.0 }
  0x62   :  { %v136_v4 = vadd.f32 %v135_v2, %v133_v3 }
  0x64   :  { %137 = vst [vmem:[#allocation2] sm:$0xff] %v136_v4 }
  0x65 PF:  { %s272_s0 = smov [#allocation10]   ;;  %s162_s27 = sshll.u32 %s338_s3, 4  ;;  %vm153_vm6 = vcmask 0   ;;  %s163_s27 = int_to_ptr.hbm [resolvable:$true] %s162_s27 }
  0x66   :  { %s160_s24 = sshll.u32 %s272_s0, 4  ;;  %s161_s24 = int_to_ptr.vmem [resolvable:$true] %s160_s24 }
  0x6b   :  { %v141_v6 = vld [vmem:[#allocation2] sm:$0xff] }
  0x6c   :  { %142 = vadd.xlane.f32.xlu0 %v141_v6 }
  0xdf   :  { %v143_v8 = vpop.xlane.xlu0 %142 }
  0xe0   :  { %v144_v9 = vrot.slane %v143_v8, 4 }
  0xe2   :  { %v145_v10 = vadd.f32 %v144_v9, %v143_v8 }
  0xe4   :  { %v146_v11 = vrot.slane %v145_v10, 2 }
  0xe6   :  { %v147_v7 = vadd.f32 %v146_v11, %v145_v10 }
  0xe8   :  { %v148_v12 = vrot.slane %v147_v7, 1 }
  0xea   :  { %v149_v13 = vadd.f32 %v148_v12, %v147_v7 }
  0xec   :  { %175 = vpush %v149_v13 }
 0x11d   :  { %s176_s28 = spop %175 }
 0x11e   :  { %s151_s29 = smul.f32 0.125, %s176_s28 }
 0x120   :  { %v152_v5 = vstv %s151_s29 }
 0x121   :  { %154 = vst.msk [vmem:[#allocation10] sm:$0x1] %vm153_vm6, %v152_v5 }
 0x122   :  { %165 = dma.vmem_to_hbm [thread:$0]  %s161_s24, 16, %s163_s27, [#allocation7]  }
 0x123   :  { %267 = dma.done.wait [#allocation7], 16  }
 0x124   :  { %268 = vsyncadd [#allocation7], 4294967280 }
 0x125   :  { %170 = vsyncpa [#allocation6], 1 }
 0x126   :  { %171 = vsyncpa [#allocation9], 1 }
 0x127   :  { %172 = vsyncpa [#allocation7], 1 }

</bundles_post_ra>
